<compile_context>
chip_gen: v6e
topology: v6e:2x2x1
jax: 0.10.0
libtpu: 0.0.40
codegen_flags: <defaults>
</compile_context>

<pallas_src>
import jax
import jax.numpy as jnp
from jax.experimental import pallas as pl
from jax.experimental.pallas import tpu as pltpu


def _rbf_kernel(x_ref, xsq_ref, ct_ref, b_ref, negs2_ref, o_ref):
    x = x_ref[...]          # (TN, D)  f32
    xsq = xsq_ref[...]      # (TN, 1)  f32  (= ||x||^2, host-precomputed)
    ct = ct_ref[...]        # (D, TO)  f32  (= centres^T * 2*sigma^2)
    b = b_ref[...]          # (1, TO)  f32  (= -||c||^2 * sigma^2)
    negs2 = negs2_ref[...]  # (1, TO)  f32  (= -sigma^2)

    # exponent = -sigma^2 * (||x||^2 - 2 x.c + ||c||^2), assembled as one MXU
    # matmul plus two cheap VPU broadcast-adds; clamp at 0 (exp <= 1).
    e = jnp.dot(x, ct, preferred_element_type=jnp.float32)   # (TN, TO) on MXU
    e = e + xsq * negs2 + b
    o_ref[...] = jnp.exp(jnp.minimum(e, 0.0)).astype(o_ref.dtype)


def _round_up(a, m):
    return ((a + m - 1) // m) * m


def rbf_forward(x, centres, sigmas, *, tn=512, to=512, out_dtype=jnp.float32):
    """x: (N, D), centres: (O, D), sigmas: (O,) -> (N, O) in `out_dtype`."""
    n, d = x.shape
    o, d2 = centres.shape
    assert d == d2

    x = x.astype(jnp.float32)
    centres = centres.astype(jnp.float32)
    sigmas = sigmas.astype(jnp.float32)

    # Host-side precompute / constant folding (hoisted out of the kernel).
    s2 = sigmas * sigmas                                       # (O,)
    ct = jnp.transpose(centres) * (2.0 * s2)[None, :]          # (D, O)
    csq = jnp.sum(centres * centres, axis=-1)                  # (O,)
    bias = (-csq * s2)[None, :]                                # (1, O)
    neg_s2 = (-s2)[None, :]                                    # (1, O)
    x_sq = jnp.sum(x * x, axis=-1, keepdims=True)              # (N, 1)

    # Tile sizes: multiples of (8, 128) unless the problem itself is smaller,
    # in which case a single block covering the full dim is used (edge blocks
    # handle any remainder — no host-side padding, no output slice).
    tn = min(tn, _round_up(n, 8))
    to = min(to, _round_up(o, 128))
    grid_n = pl.cdiv(n, tn)
    grid_o = pl.cdiv(o, to)
    grid = (grid_n, grid_o)

    # Double-buffered VMEM footprint of one grid step (+ headroom); keep v5e's
    # 16 MiB scoped default from capping us and stay well under v7x's 64 MiB.
    est = 2 * 4 * (tn * d + d * to + tn * to + tn + 2 * to)
    vmem_limit = min(max(int(est * 1.5) + (2 << 20), 16 << 20), 56 << 20)

    out = pl.pallas_call(
        _rbf_kernel,
        out_shape=jax.ShapeDtypeStruct((n, o), out_dtype),
        grid=grid,
        in_specs=[
            pl.BlockSpec((tn, d), lambda i, j: (i, 0)),   # x
            pl.BlockSpec((tn, 1), lambda i, j: (i, 0)),   # ||x||^2
            pl.BlockSpec((d, to), lambda i, j: (0, j)),   # centres^T * 2s^2
            pl.BlockSpec((1, to), lambda i, j: (0, j)),   # bias
            pl.BlockSpec((1, to), lambda i, j: (0, j)),   # -sigma^2
        ],
        out_specs=pl.BlockSpec((tn, to), lambda i, j: (i, j)),
        compiler_params=pltpu.CompilerParams(
            dimension_semantics=("parallel", "parallel"),
            vmem_limit_bytes=vmem_limit),
        cost_estimate=pl.CostEstimate(
            flops=2 * n * o * d + 3 * n * o,
            transcendentals=n * o,
            bytes_accessed=4 * (n * d * grid_o      # x re-streamed per O tile
                                + d * o * grid_n    # ct re-streamed per N tile
                                + n * o             # output, single pass
                                + n * grid_o + 2 * o * grid_n)),
    )(x, x_sq, ct, bias, neg_s2)

    return out


def rbf_reference(x, centres, sigmas):
    # Direct port of the PyTorch forward (broadcast-then-reduce).
    diff = x[:, None, :] - centres[None, :, :]                 # (N, O, D)
    dist = jnp.sqrt(jnp.sum(diff * diff, axis=-1)) * sigmas[None, :]
    return jnp.exp(-(dist ** 2))


if __name__ == "__main__":
    key = jax.random.PRNGKey(0)
    k_x, k_c = jax.random.split(key)

    N, IN_FEATURES, OUT_FEATURES = 8, 32, 16

    x = jax.random.normal(k_x, (N, IN_FEATURES), dtype=jnp.float32)
    # reset_parameters(): centres ~ N(0, 1), sigmas = 1
    centres = jax.random.normal(k_c, (OUT_FEATURES, IN_FEATURES), dtype=jnp.float32)
    sigmas = jnp.ones((OUT_FEATURES,), dtype=jnp.float32)

    out = rbf_forward(x, centres, sigmas)
    out = jax.block_until_ready(out)

    ref = rbf_reference(x, centres, sigmas)
    assert out.shape == (N, OUT_FEATURES)
    assert jnp.allclose(out, ref, atol=1e-5, rtol=1e-5), "mismatch vs reference"

    print("KERNEL_OK")
</pallas_src>

<mosaic_0001>
module attributes {stable_mosaic.version = 11 : i64} {
  func.func @_rbf_kernel(%arg0: i32, %arg1: i32, %arg2: memref<8x32xf32, #tpu.memory_space<vmem>>, %arg3: memref<8x1xf32, #tpu.memory_space<vmem>>, %arg4: memref<32x128xf32, #tpu.memory_space<vmem>>, %arg5: memref<1x128xf32, #tpu.memory_space<vmem>>, %arg6: memref<1x128xf32, #tpu.memory_space<vmem>>, %arg7: memref<8x128xf32, #tpu.memory_space<vmem>>) attributes {dimension_semantics = [#tpu.dimension_semantics<parallel>, #tpu.dimension_semantics<parallel>], iteration_bounds = array<i64: 1, 1>, scalar_prefetch = 0 : i64, scratch_operands = 0 : i64, tpu.core_type = #tpu.core_type<tc>, window_params = [{transform_indices = @transform_0, window_bounds = array<i64: 8, 32>}, {transform_indices = @transform_1, window_bounds = array<i64: 8, 1>}, {transform_indices = @transform_2, window_bounds = array<i64: 32, 128>}, {transform_indices = @transform_3, window_bounds = array<i64: 1, 128>}, {transform_indices = @transform_4, window_bounds = array<i64: 1, 128>}, {transform_indices = @transform_5, window_bounds = array<i64: 8, 128>}]} {
    %c0 = arith.constant 0 : index
    %c0_0 = arith.constant 0 : index
    %0 = vector.load %arg2[%c0, %c0_0] : memref<8x32xf32, #tpu.memory_space<vmem>>, vector<8x32xf32>
    %c0_1 = arith.constant 0 : index
    %c0_2 = arith.constant 0 : index
    %1 = vector.load %arg3[%c0_1, %c0_2] : memref<8x1xf32, #tpu.memory_space<vmem>>, vector<8x1xf32>
    %c0_3 = arith.constant 0 : index
    %c0_4 = arith.constant 0 : index
    %2 = vector.load %arg4[%c0_3, %c0_4] : memref<32x128xf32, #tpu.memory_space<vmem>>, vector<32x128xf32>
    %c0_5 = arith.constant 0 : index
    %c0_6 = arith.constant 0 : index
    %3 = vector.load %arg5[%c0_5, %c0_6] : memref<1x128xf32, #tpu.memory_space<vmem>>, vector<1x128xf32>
    %c0_7 = arith.constant 0 : index
    %c0_8 = arith.constant 0 : index
    %4 = vector.load %arg6[%c0_7, %c0_8] : memref<1x128xf32, #tpu.memory_space<vmem>>, vector<1x128xf32>
    %cst = arith.constant dense<0.000000e+00> : vector<8x128xf32>
    %5 = tpu.matmul %0, %2, %cst {dimension_numbers = #tpu.dot_dimension_numbers<[1], [0], [0], [1], [0, 0, 1, 1], [], []>} : vector<8x32xf32>, vector<32x128xf32>, vector<8x128xf32> -> vector<8x128xf32>
    %6 = vector.broadcast %1 : vector<8x1xf32> to vector<8x128xf32>
    %7 = vector.broadcast %4 : vector<1x128xf32> to vector<8x128xf32>
    %8 = arith.mulf %6, %7 : vector<8x128xf32>
    %9 = arith.addf %5, %8 : vector<8x128xf32>
    %10 = vector.broadcast %3 : vector<1x128xf32> to vector<8x128xf32>
    %11 = arith.addf %9, %10 : vector<8x128xf32>
    %cst_9 = arith.constant 0.000000e+00 : f32
    %12 = vector.broadcast %cst_9 : f32 to vector<8x128xf32>
    %13 = arith.minimumf %11, %12 : vector<8x128xf32>
    %14 = math.exp %13 : vector<8x128xf32>
    %c0_10 = arith.constant 0 : index
    %c0_11 = arith.constant 0 : index
    %15 = vector.load %arg7[%c0_10, %c0_11] : memref<8x128xf32, #tpu.memory_space<vmem>>, vector<8x128xf32>
    tpu.vector_store %arg7[%c0_10, %c0_11], %14 {strides = array<i32>} : memref<8x128xf32, #tpu.memory_space<vmem>>, vector<8x128xf32>,
    return
  }
  func.func @transform_0(%arg0: i32, %arg1: i32) -> (i32, i32) {
    %c0_i32 = arith.constant 0 : i32
    %c0_i32_0 = arith.constant 0 : i32
    return %arg0, %c0_i32 : i32, i32
  }
  func.func @transform_1(%arg0: i32, %arg1: i32) -> (i32, i32) {
    %c0_i32 = arith.constant 0 : i32
    %c0_i32_0 = arith.constant 0 : i32
    return %arg0, %c0_i32 : i32, i32
  }
  func.func @transform_2(%arg0: i32, %arg1: i32) -> (i32, i32) {
    %c0_i32 = arith.constant 0 : i32
    %c0_i32_0 = arith.constant 0 : i32
    return %c0_i32, %arg1 : i32, i32
  }
  func.func @transform_3(%arg0: i32, %arg1: i32) -> (i32, i32) {
    %c0_i32 = arith.constant 0 : i32
    %c0_i32_0 = arith.constant 0 : i32
    return %c0_i32, %arg1 : i32, i32
  }
  func.func @transform_4(%arg0: i32, %arg1: i32) -> (i32, i32) {
    %c0_i32 = arith.constant 0 : i32
    %c0_i32_0 = arith.constant 0 : i32
    return %c0_i32, %arg1 : i32, i32
  }
  func.func @transform_5(%arg0: i32, %arg1: i32) -> (i32, i32) {
    %c0_i32 = arith.constant 0 : i32
    return %arg0, %arg1 : i32, i32
  }
}

</mosaic_0001>

<bundles_post_ra>
// kernel: tpu_custom_call.1
= control target key start
LH: loop header
LB: loop body
LE: loop exit
PB: predicated region body
PF: predicated region fallthrough
CT: control target
= control target key end

     0   :  { %v188_v1 = vmov 0.0   ;;  %vm189_vm0 = vmmov 0   ;;  %v190_v4 = vmov 0   ;;  %s249_s0 = inlined_call_operand.vmem [shape: f32[8,32], index: 0, kind: input, shape index: {}]   ;;  %s250_s1 = inlined_call_operand.vmem [shape: f32[8,1], index: 1, kind: input, shape index: {}]   ;;  %s251_s2 = inlined_call_operand.vmem [shape: f32[32,16], index: 2, kind: input, shape index: {}]   ;;  %s252_s3 = inlined_call_operand.vmem [shape: f32[1,16], index: 3, kind: input, shape index: {}]   ;;  %s253_s4 = inlined_call_operand.vmem [shape: f32[1,16], index: 4, kind: input, shape index: {}]   ;;  %s254_s5 = inlined_call_operand.hbm [shape: f32[8,16], index: 5, kind: output, shape index: {}]  }
   0x1   :  { %v26_v0 = vld [vmem:[%s251_s2 + $0x18] sm:$0xff]  ;;  %148 = vmatprep.subr.mxu0 %v188_v1  ;;  %v25_v2 = vld [vmem:[%s251_s2 + $0x10] sm:$0xff]  ;;  %156 = vmatprep.mubr.msk.f32.mxu0 %vm189_vm0, %v188_v1  ;;  %v22_v3 = vld [vmem:[%s250_s1] sm:$0xff] }
   0x2   :  { %149 = vmatpush3.msra.mxu0 %v26_v0  ;;  %163 = vset.pattern.permute.xlu0 %v190_v4 }
   0x3   :  { %10 = vsyncpa [#allocation3], 0  ;;  %150 = vmatprep.subr.mxu0 %v188_v1  ;;  %v24_v5 = vld [vmem:[%s251_s2 + $0x8] sm:$0xff]  ;;  %31 = vperm.xlu0 %163, %v22_v3   ;;  %v23_v6 = vld [vmem:[%s251_s2] sm:$0xff]  ;;  %vm41_vm1 = vcmask 261120  }
   0x4   :  { %151 = vmatpush3.msra.mxu0 %v25_v2  ;;  %v21_v7 = vld [vmem:[%s249_s0] sm:$0xff]  ;;  %s191_s0 = smov [#allocation2]  }
   0x5   :  { %152 = vmatprep.subr.mxu0 %v188_v1  ;;  %v140_v8 = vld [vmem:[%s253_s4] ss:$0 sm:$0xff]  ;;  %s132_s2 = sshll.u32 %s191_s0, 4  ;;  %s133_s2 = int_to_ptr.vmem [resolvable:$true] %s132_s2 }
   0x6   :  { %153 = vmatpush3.msra.mxu0 %v24_v5  ;;  %v142_v11 = vld [vmem:[%s252_s3] ss:$0 sm:$0xff]  ;;  %s166_s8 = scalar_lea.vmem %s133_s2, 128  ;;  %p171_p1 = scmp.lt.s32.totalorder %s133_s2, %s133_s2 }
   0x7   :  { %154 = vmatprep.subr.mxu0 %v188_v1  ;;  %p167_p0 = scmp.ne.s32.totalorder %s133_s2, %s166_s8  ;;  %p172_p2 = scmp.lt.s32.totalorder %s166_s8, %s166_s8 }
   0x8   :  { %155 = vmatpush3.msra.mxu0 %v23_v6 }
   0x9   :  { %157 = vmatmul.mubr.msk.f32.vlgmr.msra.gmra.mxu0 %vm41_vm1, %v21_v7  ;;  %p173_p3 = por %p172_p2, %p171_p1 }
   0xb   :  { %p174_p4 = pnand %p173_p3, %p167_p0 }
  0x7e   :  { %v32_v9 = vpop.permute.xlu0 %31 }
  0x7f   :  { %v40_v10 = vmul.f32 %v140_v8, %v32_v9 }
  0xc9   :  { %v111_v12 = vpop.f32.mrf.mxu0 }
  0xca   :  { %v112_v13 = vadd.f32 %v111_v12, %v40_v10 }
  0xcb   :  { %v158_v14 = vpop.f32.mrf.mxu0 }
  0xcc   :  { %v121_v15 = vadd.f32 %v142_v11, %v112_v13 }
  0xce   :  { %v122_v16 = vmin.f32 %v121_v15, 0.0 }
  0xd0   :  { %v123_v17 = vmul.f32 1.442695, %v122_v16 }
  0xd2   :  { %164 = vpow2.f32 %v123_v17 }
  0xdf   :  { %v165_v18 = vpop.eup %164 }
  0xe0   :  { %125 = vst [vmem:[#allocation2] sm:$0xff] %v165_v18 }
  0xe1   :  { %177 = shalt.err (!%p174_p4)
}
  0xe2   :  { %135 = dma.vmem_to_hbm [thread:$0]  %s133_s2, 128, %s254_s5, [#allocation3]  }
  0xe3   :  { %186 = dma.done.wait [#allocation3], 128  }
  0xe4   :  { %187 = vsyncadd [#allocation3], 4294967168 }
  0xe5   :  { %139 = vsyncpa [#allocation3], 1 }

</bundles_post_ra>
